<compile_context>
chip_gen: v5e
topology: v5e:2x2
jax: 0.10.0
libtpu: 0.0.40
codegen_flags: <defaults>
</compile_context>

<pallas_src>
import functools

import jax
import jax.numpy as jnp
import numpy as np
from jax.experimental import pallas as pl
from jax.experimental.pallas import tpu as pltpu

# ---------------- config (small, TPU-friendly, lane-aligned shapes) ----------
N = 8                   # batch size (sublane multiple)
C, H, W = 4, 8, 8       # image channels / spatial  -> D_IN = 256
D_IN = C * H * W        # 256
HIDDEN = 128
OUT_DIM = 128           # MoCo feature dim
K_QUEUE = 128           # queue size: lane multiple, K % batch == 0
MOM = 0.99              # momentum m
TEMP = 0.1              # temperature T
EPS = 1e-12             # F.normalize eps

# Alignment invariants the kernel relies on.
assert N % 8 == 0, "batch must be a sublane multiple"
assert K_QUEUE % N == 0, "queue size must be a multiple of the batch size"
assert D_IN % 128 == 0 and HIDDEN % 128 == 0 and OUT_DIM % 128 == 0
assert HIDDEN == OUT_DIM, "(2, HIDDEN) bias packing assumes equal layer widths"


# ---------------- fused Pallas kernel ----------------
def _fused_moco_kernel(im1_ref, im2_ref,
                       w1q_ref, w2q_ref, bq_ref,
                       w1k_ref, w2k_ref, bk_ref,
                       queue_hbm_in, ptr_ref,
                       w1k_out, w2k_out, bk_out,
                       queue_hbm_out, loss_ref,
                       queue_vmem, k_vmem, dma_sems,
                       *, m, temp):
    f32 = jnp.float32
    bf16 = jnp.bfloat16
    n = im1_ref.shape[0]
    hid = w1q_ref.shape[1]
    dim = w2q_ref.shape[1]

    # Kick off the queue read DMA (HBM -> VMEM); it overlaps both encoders.
    read_cp = pltpu.make_async_copy(queue_hbm_in, queue_vmem, dma_sems.at[0])
    read_cp.start()

    # ---- momentum update of the key encoder (f32 masters, VPU) ----
    one_minus_m = 1.0 - m
    w1q = w1q_ref[...]
    w2q = w2q_ref[...]
    bq = bq_ref[...]
    w1k = w1k_ref[...] * m + w1q * one_minus_m
    w2k = w2k_ref[...] * m + w2q * one_minus_m
    bk = bk_ref[...] * m + bq * one_minus_m
    w1k_out[...] = w1k
    w2k_out[...] = w2k
    bk_out[...] = bk

    # ---- fused q/k encoder: one 256-wide matmul per layer (bf16 MXU, f32 acc)
    # rows [0:n)  -> query path with the query params
    # rows [n:2n) -> key path with the *updated* key params
    x = jnp.concatenate([im1_ref[...], im2_ref[...]], axis=0).astype(bf16)
    w1cat = jnp.concatenate([w1q, w1k], axis=1).astype(bf16)           # [D_IN, 2H]
    z1 = jnp.dot(x, w1cat, preferred_element_type=f32)                 # [2n, 2H]
    hq = jnp.maximum(z1[:n, :hid] + bq[0:1, :], 0.0)
    hk = jnp.maximum(z1[n:, hid:] + bk[0:1, :], 0.0)

    h = jnp.concatenate([hq, hk], axis=0).astype(bf16)                 # [2n, H]
    w2cat = jnp.concatenate([w2q, w2k], axis=1).astype(bf16)           # [H, 2D]
    z2 = jnp.dot(h, w2cat, preferred_element_type=f32)                 # [2n, 2D]
    fq = z2[:n, :dim] + bq[1:2, :]
    fk = z2[n:, dim:] + bk[1:2, :]

    def l2_normalize(f):
        ss = jnp.sum(f * f, axis=-1, keepdims=True)
        # f * rsqrt(max(ss, eps^2)) == f / max(||f||, eps)  (EUP rsqrt, no divide)
        return f * jax.lax.rsqrt(jnp.maximum(ss, EPS * EPS))

    q = l2_normalize(fq)
    k = l2_normalize(fk)
    k_vmem[...] = k                      # staging buffer for the enqueue DMA

    # ---- dequeue_and_enqueue: DMA only the N new key rows into the HBM queue.
    # The old negatives must have been read (for l_neg) before we overwrite.
    read_cp.wait()
    ptr = ptr_ref[0]
    write_cp = pltpu.make_async_copy(
        k_vmem, queue_hbm_out.at[pl.ds(ptr, n)], dma_sems.at[1])
    write_cp.start()                     # overlaps with the loss math below

    # ---- contrastive logits + cross-entropy (labels == 0); f32 softmax ----
    inv_t = 1.0 / temp
    l_pos = jnp.sum(q * k, axis=-1, keepdims=True) * inv_t             # [n, 1]
    l_neg = jax.lax.dot_general(                                       # q @ queue^T
        q.astype(bf16), queue_vmem[...].astype(bf16),
        (((1,), (1,)), ((), ())),
        preferred_element_type=f32) * inv_t                            # [n, K]
    mx = jnp.maximum(l_pos, jnp.max(l_neg, axis=-1, keepdims=True))
    sumexp = jnp.exp(l_pos - mx) + jnp.sum(jnp.exp(l_neg - mx), axis=-1,
                                           keepdims=True)
    lse = mx + jnp.log(sumexp)
    loss_ref[...] = jnp.sum(lse - l_pos, axis=0, keepdims=True) * (1.0 / n)

    write_cp.wait()


def fused_moco_step(im1_flat, im2_flat, params_q, params_k, queue, queue_ptr,
                    m=MOM, temp=TEMP):
    vmem = pl.BlockSpec(memory_space=pltpu.MemorySpace.VMEM)
    smem = pl.BlockSpec(memory_space=pltpu.MemorySpace.SMEM)
    hbm = pl.BlockSpec(memory_space=pl.ANY)
    w1q, w2q, bq = params_q
    w1k, w2k, bk = params_k

    out_shape = (
        jax.ShapeDtypeStruct(w1k.shape, w1k.dtype),
        jax.ShapeDtypeStruct(w2k.shape, w2k.dtype),
        jax.ShapeDtypeStruct(bk.shape, bk.dtype),
        jax.ShapeDtypeStruct(queue.shape, queue.dtype),
        jax.ShapeDtypeStruct((1, 1), jnp.float32),
    )
    fn = pl.pallas_call(
        functools.partial(_fused_moco_kernel, m=m, temp=temp),
        in_specs=[vmem, vmem,                  # im1, im2
                  vmem, vmem, vmem,            # params_q  (w1, w2, b12)
                  vmem, vmem, vmem,            # params_k  (aliased)
                  hbm,                         # queue stays in HBM (aliased)
                  smem],                       # queue_ptr
        out_specs=(vmem, vmem, vmem, hbm, vmem),
        out_shape=out_shape,
        scratch_shapes=[
            pltpu.VMEM(queue.shape, queue.dtype),                       # negatives
            pltpu.VMEM((im2_flat.shape[0], queue.shape[1]), queue.dtype),  # new keys
            pltpu.SemaphoreType.DMA((2,)),
        ],
        # in-place update of key-encoder params and the HBM queue buffer
        input_output_aliases={5: 0, 6: 1, 7: 2, 8: 3},
    )
    ptr_arr = jnp.asarray(queue_ptr, jnp.int32).reshape((1,))
    w1k_n, w2k_n, bk_n, new_queue, loss = fn(
        im1_flat, im2_flat, w1q, w2q, bq, w1k, w2k, bk, queue, ptr_arr)
    return loss[0, 0], (w1k_n, w2k_n, bk_n), new_queue


# ---------------- MoCo forward (single fused kernel + trivial glue) ----------
@jax.jit
def moco_forward(params_q, params_k, queue, queue_ptr, im1, im2):
    im1_flat = im1.reshape(im1.shape[0], -1)
    im2_flat = im2.reshape(im2.shape[0], -1)
    loss, new_params_k, new_queue = fused_moco_step(
        im1_flat, im2_flat, params_q, params_k, queue, queue_ptr)
    new_ptr = (queue_ptr + im2.shape[0]) % K_QUEUE
    return loss, new_params_k, new_queue, new_ptr


# ---------------- pure-JAX reference (mirrors the kernel's bf16 MXU feed) ----
def _ref_forward(params_q, params_k, queue, queue_ptr, im1, im2):
    bf16 = jnp.bfloat16
    f32 = jnp.float32
    new_pk = tuple(pk * MOM + pq * (1.0 - MOM)
                   for pq, pk in zip(params_q, params_k))

    def encode(x, params):
        w1, w2, b = params
        h = jnp.dot(x.astype(bf16), w1.astype(bf16),
                    preferred_element_type=f32) + b[0:1]
        h = jnp.maximum(h, 0.0)
        f = jnp.dot(h.astype(bf16), w2.astype(bf16),
                    preferred_element_type=f32) + b[1:2]
        ss = jnp.sum(f * f, axis=-1, keepdims=True)
        return f * jax.lax.rsqrt(jnp.maximum(ss, EPS * EPS))

    q = encode(im1.reshape(im1.shape[0], -1), params_q)
    k = encode(im2.reshape(im2.shape[0], -1), new_pk)
    l_pos = jnp.sum(q * k, axis=-1, keepdims=True)
    l_neg = jnp.dot(q.astype(bf16), queue.T.astype(bf16),
                    preferred_element_type=f32)
    logits = jnp.concatenate([l_pos, l_neg], axis=1) / TEMP
    mx = jnp.max(logits, axis=1, keepdims=True)
    lse = mx[:, 0] + jnp.log(jnp.sum(jnp.exp(logits - mx), axis=1))
    loss = jnp.mean(lse - logits[:, 0])
    n = k.shape[0]
    ptr = int(queue_ptr[0])
    new_queue = queue.at[ptr:ptr + n].set(k)
    return loss, new_pk, new_queue


# ---------------- main ----------------
if __name__ == "__main__":
    root = jax.random.PRNGKey(0)
    k_w1, k_b1, k_w2, k_b2, k_queue, k_im1, k_im2 = jax.random.split(root, 7)

    # encoder params; biases packed as one (2, 128) array (row 0 = b1, row 1 = b2)
    w1 = jax.random.normal(k_w1, (D_IN, HIDDEN), jnp.float32) * 0.05
    b1 = jax.random.normal(k_b1, (1, HIDDEN), jnp.float32) * 0.01
    w2 = jax.random.normal(k_w2, (HIDDEN, OUT_DIM), jnp.float32) * 0.05
    b2 = jax.random.normal(k_b2, (1, OUT_DIM), jnp.float32) * 0.01
    b12 = jnp.concatenate([b1, b2], axis=0)
    params_q = (w1, w2, b12)
    params_k = tuple(jnp.array(p) for p in params_q)   # key encoder starts == query

    # queue buffer stored row-major [K, D] (lane-dense); PyTorch keeps [D, K].
    queue0 = jax.random.normal(k_queue, (K_QUEUE, OUT_DIM), jnp.float32)
    queue = queue0 / jnp.maximum(
        jnp.linalg.norm(queue0, axis=1, keepdims=True), EPS)
    queue_ptr = jnp.zeros((1,), jnp.int32)

    # inputs: batches of query / key images, NCHW
    im1 = jax.random.normal(k_im1, (N, C, H, W), jnp.float32)
    im2 = jax.random.normal(k_im2, (N, C, H, W), jnp.float32)

    loss, new_params_k, new_queue, new_ptr = moco_forward(
        params_q, params_k, queue, queue_ptr, im1, im2)
    loss = jax.block_until_ready(loss)
    new_queue = jax.block_until_ready(new_queue)

    # ---- sanity checks against the pure-JAX reference ----
    ref_loss, ref_params_k, ref_queue = _ref_forward(
        params_q, params_k, queue, queue_ptr, im1, im2)
    assert np.isfinite(float(loss))
    assert abs(float(loss) - float(ref_loss)) < 5e-3, (float(loss), float(ref_loss))
    # momentum update of the key params
    for p_new, p_ref in zip(new_params_k, ref_params_k):
        assert np.allclose(np.asarray(p_new), np.asarray(p_ref), atol=1e-5)
    # queue enqueue: rows [0:N) hold the new keys, all other rows untouched
    assert new_queue.shape == (K_QUEUE, OUT_DIM)
    assert np.allclose(np.asarray(new_queue[:N]), np.asarray(ref_queue[:N]),
                       atol=5e-3)
    assert np.array_equal(np.asarray(new_queue[N:]), np.asarray(queue[N:]))
    assert int(new_ptr[0]) == N % K_QUEUE

    print("KERNEL_OK")
</pallas_src>

<mosaic_0001>
module attributes {stable_mosaic.version = 11 : i64} {
  func.func @_fused_moco_kernel(%arg0: memref<8x256xf32, #tpu.memory_space<vmem>>, %arg1: memref<8x256xf32, #tpu.memory_space<vmem>>, %arg2: memref<256x128xf32, #tpu.memory_space<vmem>>, %arg3: memref<128x128xf32, #tpu.memory_space<vmem>>, %arg4: memref<2x128xf32, #tpu.memory_space<vmem>>, %arg5: memref<256x128xf32, #tpu.memory_space<vmem>>, %arg6: memref<128x128xf32, #tpu.memory_space<vmem>>, %arg7: memref<2x128xf32, #tpu.memory_space<vmem>>, %arg8: memref<128x128xf32, #tpu.memory_space<any>>, %arg9: memref<1xi32, #tpu.memory_space<smem>>, %arg10: memref<256x128xf32, #tpu.memory_space<vmem>>, %arg11: memref<128x128xf32, #tpu.memory_space<vmem>>, %arg12: memref<2x128xf32, #tpu.memory_space<vmem>>, %arg13: memref<128x128xf32, #tpu.memory_space<any>>, %arg14: memref<1x1xf32, #tpu.memory_space<vmem>>, %arg15: memref<128x128xf32, #tpu.memory_space<vmem>>, %arg16: memref<8x128xf32, #tpu.memory_space<vmem>>, %arg17: memref<2x!tpu.dma_semaphore, #tpu.memory_space<semaphore_mem>>) attributes {dimension_semantics = [], scalar_prefetch = 0 : i64, scratch_operands = 3 : i64, tpu.core_type = #tpu.core_type<tc>} {
    %c0_i32 = arith.constant 0 : i32
    %0 = tpu.memref_slice %arg17[%c0_i32] : memref<2x!tpu.dma_semaphore, #tpu.memory_space<semaphore_mem>> -> memref<1x!tpu.dma_semaphore, #tpu.memory_space<semaphore_mem>>
    %1 = tpu.memref_squeeze %0 : memref<1x!tpu.dma_semaphore, #tpu.memory_space<semaphore_mem>> -> memref<!tpu.dma_semaphore, #tpu.memory_space<semaphore_mem>>
    tpu.enqueue_dma source(%arg8 : memref<128x128xf32, #tpu.memory_space<any>>) target(%arg15 : memref<128x128xf32, #tpu.memory_space<vmem>>) target_semaphore(%1 : memref<!tpu.dma_semaphore, #tpu.memory_space<semaphore_mem>>)
    %c0 = arith.constant 0 : index
    %c0_0 = arith.constant 0 : index
    %2 = vector.load %arg2[%c0, %c0_0] : memref<256x128xf32, #tpu.memory_space<vmem>>, vector<256x128xf32>
    %c0_1 = arith.constant 0 : index
    %c0_2 = arith.constant 0 : index
    %3 = vector.load %arg3[%c0_1, %c0_2] : memref<128x128xf32, #tpu.memory_space<vmem>>, vector<128x128xf32>
    %c0_3 = arith.constant 0 : index
    %c0_4 = arith.constant 0 : index
    %4 = vector.load %arg4[%c0_3, %c0_4] : memref<2x128xf32, #tpu.memory_space<vmem>>, vector<2x128xf32>
    %c0_5 = arith.constant 0 : index
    %c0_6 = arith.constant 0 : index
    %5 = vector.load %arg5[%c0_5, %c0_6] : memref<256x128xf32, #tpu.memory_space<vmem>>, vector<256x128xf32>
    %cst = arith.constant 9.900000e-01 : f32
    %6 = vector.broadcast %cst : f32 to vector<256x128xf32>
    %7 = arith.mulf %5, %6 : vector<256x128xf32>
    %cst_7 = arith.constant 0.00999999977 : f32
    %8 = vector.broadcast %cst_7 : f32 to vector<256x128xf32>
    %9 = arith.mulf %2, %8 : vector<256x128xf32>
    %10 = arith.addf %7, %9 : vector<256x128xf32>
    %c0_8 = arith.constant 0 : index
    %c0_9 = arith.constant 0 : index
    %11 = vector.load %arg6[%c0_8, %c0_9] : memref<128x128xf32, #tpu.memory_space<vmem>>, vector<128x128xf32>
    %cst_10 = arith.constant 9.900000e-01 : f32
    %12 = vector.broadcast %cst_10 : f32 to vector<128x128xf32>
    %13 = arith.mulf %11, %12 : vector<128x128xf32>
    %cst_11 = arith.constant 0.00999999977 : f32
    %14 = vector.broadcast %cst_11 : f32 to vector<128x128xf32>
    %15 = arith.mulf %3, %14 : vector<128x128xf32>
    %16 = arith.addf %13, %15 : vector<128x128xf32>
    %c0_12 = arith.constant 0 : index
    %c0_13 = arith.constant 0 : index
    %17 = vector.load %arg7[%c0_12, %c0_13] : memref<2x128xf32, #tpu.memory_space<vmem>>, vector<2x128xf32>
    %cst_14 = arith.constant 9.900000e-01 : f32
    %18 = vector.broadcast %cst_14 : f32 to vector<2x128xf32>
    %19 = arith.mulf %17, %18 : vector<2x128xf32>
    %cst_15 = arith.constant 0.00999999977 : f32
    %20 = vector.broadcast %cst_15 : f32 to vector<2x128xf32>
    %21 = arith.mulf %4, %20 : vector<2x128xf32>
    %22 = arith.addf %19, %21 : vector<2x128xf32>
    %c0_16 = arith.constant 0 : index
    %c0_17 = arith.constant 0 : index
    %23 = vector.load %arg10[%c0_16, %c0_17] : memref<256x128xf32, #tpu.memory_space<vmem>>, vector<256x128xf32>
    tpu.vector_store %arg10[%c0_16, %c0_17], %10 {strides = array<i32>} : memref<256x128xf32, #tpu.memory_space<vmem>>, vector<256x128xf32>,
    %c0_18 = arith.constant 0 : index
    %c0_19 = arith.constant 0 : index
    %24 = vector.load %arg11[%c0_18, %c0_19] : memref<128x128xf32, #tpu.memory_space<vmem>>, vector<128x128xf32>
    tpu.vector_store %arg11[%c0_18, %c0_19], %16 {strides = array<i32>} : memref<128x128xf32, #tpu.memory_space<vmem>>, vector<128x128xf32>,
    %c0_20 = arith.constant 0 : index
    %c0_21 = arith.constant 0 : index
    %25 = vector.load %arg12[%c0_20, %c0_21] : memref<2x128xf32, #tpu.memory_space<vmem>>, vector<2x128xf32>
    tpu.vector_store %arg12[%c0_20, %c0_21], %22 {strides = array<i32>} : memref<2x128xf32, #tpu.memory_space<vmem>>, vector<2x128xf32>,
    %c0_22 = arith.constant 0 : index
    %c0_23 = arith.constant 0 : index
    %26 = vector.load %arg0[%c0_22, %c0_23] : memref<8x256xf32, #tpu.memory_space<vmem>>, vector<8x256xf32>
    %c0_24 = arith.constant 0 : index
    %c0_25 = arith.constant 0 : index
    %27 = vector.load %arg1[%c0_24, %c0_25] : memref<8x256xf32, #tpu.memory_space<vmem>>, vector<8x256xf32>
    %28 = tpu.concatenate %26, %27 in 0 : vector<8x256xf32>, vector<8x256xf32> -> vector<16x256xf32>
    %29 = arith.truncf %28 : vector<16x256xf32> to vector<16x256xbf16>
    %30 = tpu.concatenate %2, %10 in 1 : vector<256x128xf32>, vector<256x128xf32> -> vector<256x256xf32>
    %31 = arith.truncf %30 : vector<256x256xf32> to vector<256x256xbf16>
    %cst_26 = arith.constant dense<0.000000e+00> : vector<16x256xf32>
    %32 = tpu.matmul %29, %31, %cst_26 {dimension_numbers = #tpu.dot_dimension_numbers<[1], [0], [0], [1], [0, 0, 1, 1], [], []>} : vector<16x256xbf16>, vector<256x256xbf16>, vector<16x256xf32> -> vector<16x256xf32>
    %33 = vector.extract_strided_slice %32 {offsets = [0, 0], sizes = [8, 128], strides = [1, 1]} : vector<16x256xf32> to vector<8x128xf32>
    %34 = vector.extract_strided_slice %4 {offsets = [0, 0], sizes = [1, 128], strides = [1, 1]} : vector<2x128xf32> to vector<1x128xf32>
    %35 = vector.broadcast %34 : vector<1x128xf32> to vector<8x128xf32>
    %36 = arith.addf %33, %35 : vector<8x128xf32>
    %cst_27 = arith.constant 0.000000e+00 : f32
    %37 = vector.broadcast %cst_27 : f32 to vector<8x128xf32>
    %38 = arith.maximumf %36, %37 : vector<8x128xf32>
    %39 = vector.extract_strided_slice %32 {offsets = [8, 128], sizes = [8, 128], strides = [1, 1]} : vector<16x256xf32> to vector<8x128xf32>
    %40 = vector.extract_strided_slice %22 {offsets = [0, 0], sizes = [1, 128], strides = [1, 1]} : vector<2x128xf32> to vector<1x128xf32>
    %41 = vector.broadcast %40 : vector<1x128xf32> to vector<8x128xf32>
    %42 = arith.addf %39, %41 : vector<8x128xf32>
    %cst_28 = arith.constant 0.000000e+00 : f32
    %43 = vector.broadcast %cst_28 : f32 to vector<8x128xf32>
    %44 = arith.maximumf %42, %43 : vector<8x128xf32>
    %45 = tpu.concatenate %38, %44 in 0 : vector<8x128xf32>, vector<8x128xf32> -> vector<16x128xf32>
    %46 = arith.truncf %45 : vector<16x128xf32> to vector<16x128xbf16>
    %47 = tpu.concatenate %3, %16 in 1 : vector<128x128xf32>, vector<128x128xf32> -> vector<128x256xf32>
    %48 = arith.truncf %47 : vector<128x256xf32> to vector<128x256xbf16>
    %cst_29 = arith.constant dense<0.000000e+00> : vector<16x256xf32>
    %49 = tpu.matmul %46, %48, %cst_29 {dimension_numbers = #tpu.dot_dimension_numbers<[1], [0], [0], [1], [0, 0, 1, 1], [], []>} : vector<16x128xbf16>, vector<128x256xbf16>, vector<16x256xf32> -> vector<16x256xf32>
    %50 = vector.extract_strided_slice %49 {offsets = [0, 0], sizes = [8, 128], strides = [1, 1]} : vector<16x256xf32> to vector<8x128xf32>
    %51 = vector.extract_strided_slice %4 {offsets = [1, 0], sizes = [1, 128], strides = [1, 1]} : vector<2x128xf32> to vector<1x128xf32>
    %52 = vector.broadcast %51 : vector<1x128xf32> to vector<8x128xf32>
    %53 = arith.addf %50, %52 : vector<8x128xf32>
    %54 = vector.extract_strided_slice %49 {offsets = [8, 128], sizes = [8, 128], strides = [1, 1]} : vector<16x256xf32> to vector<8x128xf32>
    %55 = vector.extract_strided_slice %22 {offsets = [1, 0], sizes = [1, 128], strides = [1, 1]} : vector<2x128xf32> to vector<1x128xf32>
    %56 = vector.broadcast %55 : vector<1x128xf32> to vector<8x128xf32>
    %57 = arith.addf %54, %56 : vector<8x128xf32>
    %58 = arith.mulf %53, %53 : vector<8x128xf32>
    %cst_30 = arith.constant dense<0.000000e+00> : vector<8xf32>
    %59 = vector.multi_reduction <add>, %58, %cst_30 [1] : vector<8x128xf32> to vector<8xf32>
    %60 = vector.shape_cast %59 : vector<8xf32> to vector<8x1xf32>
    %cst_31 = arith.constant 1.000000e-24 : f32
    %61 = vector.broadcast %cst_31 : f32 to vector<8x1xf32>
    %62 = arith.maximumf %60, %61 : vector<8x1xf32>
    %63 = math.rsqrt %62 : vector<8x1xf32>
    %64 = vector.broadcast %63 : vector<8x1xf32> to vector<8x128xf32>
    %65 = arith.mulf %53, %64 : vector<8x128xf32>
    %66 = arith.mulf %57, %57 : vector<8x128xf32>
    %cst_32 = arith.constant dense<0.000000e+00> : vector<8xf32>
    %67 = vector.multi_reduction <add>, %66, %cst_32 [1] : vector<8x128xf32> to vector<8xf32>
    %68 = vector.shape_cast %67 : vector<8xf32> to vector<8x1xf32>
    %cst_33 = arith.constant 1.000000e-24 : f32
    %69 = vector.broadcast %cst_33 : f32 to vector<8x1xf32>
    %70 = arith.maximumf %68, %69 : vector<8x1xf32>
    %71 = math.rsqrt %70 : vector<8x1xf32>
    %72 = vector.broadcast %71 : vector<8x1xf32> to vector<8x128xf32>
    %73 = arith.mulf %57, %72 : vector<8x128xf32>
    %c0_34 = arith.constant 0 : index
    %c0_35 = arith.constant 0 : index
    %74 = vector.load %arg16[%c0_34, %c0_35] : memref<8x128xf32, #tpu.memory_space<vmem>>, vector<8x128xf32>
    tpu.vector_store %arg16[%c0_34, %c0_35], %73 {strides = array<i32>} : memref<8x128xf32, #tpu.memory_space<vmem>>, vector<8x128xf32>,
    %c0_i32_36 = arith.constant 0 : i32
    %75 = tpu.memref_slice %arg17[%c0_i32_36] : memref<2x!tpu.dma_semaphore, #tpu.memory_space<semaphore_mem>> -> memref<1x!tpu.dma_semaphore, #tpu.memory_space<semaphore_mem>>
    %76 = tpu.memref_squeeze %75 : memref<1x!tpu.dma_semaphore, #tpu.memory_space<semaphore_mem>> -> memref<!tpu.dma_semaphore, #tpu.memory_space<semaphore_mem>>
    tpu.wait_dma2 semaphore(%76 : memref<!tpu.dma_semaphore, #tpu.memory_space<semaphore_mem>>) src(%arg8 : memref<128x128xf32, #tpu.memory_space<any>>) dst(%arg15 : memref<128x128xf32, #tpu.memory_space<vmem>>)
    %c0_37 = arith.constant 0 : index
    %77 = memref.load %arg9[%c0_37] : memref<1xi32, #tpu.memory_space<smem>>
    %c1_i32 = arith.constant 1 : i32
    %c0_i32_38 = arith.constant 0 : i32
    %78 = tpu.memref_slice %arg13[%77, %c0_i32_38] : memref<128x128xf32, #tpu.memory_space<any>> -> memref<8x128xf32, #tpu.memory_space<any>>
    %79 = tpu.memref_slice %arg17[%c1_i32] : memref<2x!tpu.dma_semaphore, #tpu.memory_space<semaphore_mem>> -> memref<1x!tpu.dma_semaphore, #tpu.memory_space<semaphore_mem>>
    %80 = tpu.memref_squeeze %79 : memref<1x!tpu.dma_semaphore, #tpu.memory_space<semaphore_mem>> -> memref<!tpu.dma_semaphore, #tpu.memory_space<semaphore_mem>>
    tpu.enqueue_dma source(%arg16 : memref<8x128xf32, #tpu.memory_space<vmem>>) target(%78 : memref<8x128xf32, #tpu.memory_space<any>>) target_semaphore(%80 : memref<!tpu.dma_semaphore, #tpu.memory_space<semaphore_mem>>)
    %81 = arith.mulf %65, %73 : vector<8x128xf32>
    %cst_39 = arith.constant dense<0.000000e+00> : vector<8xf32>
    %82 = vector.multi_reduction <add>, %81, %cst_39 [1] : vector<8x128xf32> to vector<8xf32>
    %83 = vector.shape_cast %82 : vector<8xf32> to vector<8x1xf32>
    %cst_40 = arith.constant 1.000000e+01 : f32
    %84 = vector.broadcast %cst_40 : f32 to vector<8x1xf32>
    %85 = arith.mulf %83, %84 : vector<8x1xf32>
    %86 = arith.truncf %65 : vector<8x128xf32> to vector<8x128xbf16>
    %c0_41 = arith.constant 0 : index
    %c0_42 = arith.constant 0 : index
    %87 = vector.load %arg15[%c0_41, %c0_42] : memref<128x128xf32, #tpu.memory_space<vmem>>, vector<128x128xf32>
    %88 = arith.truncf %87 : vector<128x128xf32> to vector<128x128xbf16>
    %cst_43 = arith.constant dense<0.000000e+00> : vector<8x128xf32>
    %89 = tpu.matmul %86, %88, %cst_43 {dimension_numbers = #tpu.dot_dimension_numbers<[1], [1], [0], [0], [0, 0, 1, 0], [], []>} : vector<8x128xbf16>, vector<128x128xbf16>, vector<8x128xf32> -> vector<8x128xf32>
    %cst_44 = arith.constant 1.000000e+01 : f32
    %90 = vector.broadcast %cst_44 : f32 to vector<8x128xf32>
    %91 = arith.mulf %89, %90 : vector<8x128xf32>
    %cst_45 = arith.constant dense<0xFF800000> : vector<8xf32>
    %92 = vector.multi_reduction <maximumf>, %91, %cst_45 [1] : vector<8x128xf32> to vector<8xf32>
    %93 = vector.shape_cast %92 : vector<8xf32> to vector<8x1xf32>
    %94 = arith.maximumf %85, %93 : vector<8x1xf32>
    %95 = arith.subf %85, %94 : vector<8x1xf32>
    %96 = math.exp %95 : vector<8x1xf32>
    %97 = vector.broadcast %94 : vector<8x1xf32> to vector<8x128xf32>
    %98 = arith.subf %91, %97 : vector<8x128xf32>
    %99 = math.exp %98 : vector<8x128xf32>
    %cst_46 = arith.constant dense<0.000000e+00> : vector<8xf32>
    %100 = vector.multi_reduction <add>, %99, %cst_46 [1] : vector<8x128xf32> to vector<8xf32>
    %101 = vector.shape_cast %100 : vector<8xf32> to vector<8x1xf32>
    %102 = arith.addf %96, %101 : vector<8x1xf32>
    %103 = math.log %102 : vector<8x1xf32>
    %104 = arith.addf %94, %103 : vector<8x1xf32>
    %105 = arith.subf %104, %85 : vector<8x1xf32>
    %cst_47 = arith.constant dense<0.000000e+00> : vector<1xf32>
    %106 = vector.multi_reduction <add>, %105, %cst_47 [0] : vector<8x1xf32> to vector<1xf32>
    %107 = vector.shape_cast %106 : vector<1xf32> to vector<1x1xf32>
    %cst_48 = arith.constant 1.250000e-01 : f32
    %108 = vector.broadcast %cst_48 : f32 to vector<1x1xf32>
    %109 = arith.mulf %107, %108 : vector<1x1xf32>
    %c0_49 = arith.constant 0 : index
    %c0_50 = arith.constant 0 : index
    %110 = vector.load %arg14[%c0_49, %c0_50] : memref<1x1xf32, #tpu.memory_space<vmem>>, vector<1x1xf32>
    tpu.vector_store %arg14[%c0_49, %c0_50], %109 {strides = array<i32>} : memref<1x1xf32, #tpu.memory_space<vmem>>, vector<1x1xf32>,
    %c1_i32_51 = arith.constant 1 : i32
    %c0_i32_52 = arith.constant 0 : i32
    %111 = tpu.memref_slice %arg13[%77, %c0_i32_52] : memref<128x128xf32, #tpu.memory_space<any>> -> memref<8x128xf32, #tpu.memory_space<any>>
    %112 = tpu.memref_slice %arg17[%c1_i32_51] : memref<2x!tpu.dma_semaphore, #tpu.memory_space<semaphore_mem>> -> memref<1x!tpu.dma_semaphore, #tpu.memory_space<semaphore_mem>>
    %113 = tpu.memref_squeeze %112 : memref<1x!tpu.dma_semaphore, #tpu.memory_space<semaphore_mem>> -> memref<!tpu.dma_semaphore, #tpu.memory_space<semaphore_mem>>
    tpu.wait_dma2 semaphore(%113 : memref<!tpu.dma_semaphore, #tpu.memory_space<semaphore_mem>>) src(%arg16 : memref<8x128xf32, #tpu.memory_space<vmem>>) dst(%111 : memref<8x128xf32, #tpu.memory_space<any>>)
    return
  }
}

</mosaic_0001>

<bundles_post_ra>
// kernel: moco_forward.1
= control target key start
LH: loop header
LB: loop body
LE: loop exit
PB: predicated region body
PF: predicated region fallthrough
CT: control target
= control target key end

     0   :  { %21 = vsyncpa [#allocation7], 0  ;;  %s1523_s0 = inlined_call_operand.vmem [shape: f32[8,256], index: 0, kind: input, shape index: {}]   ;;  %s1524_s1 = inlined_call_operand.vmem [shape: f32[8,256], index: 1, kind: input, shape index: {}]   ;;  %s1525_s2 = inlined_call_operand.vmem [shape: f32[256,128], index: 2, kind: input, shape index: {}]   ;;  %s1526_s3 = inlined_call_operand.vmem [shape: f32[128,128], index: 3, kind: input, shape index: {}]   ;;  %s1527_s4 = inlined_call_operand.vmem [shape: f32[2,128], index: 4, kind: input, shape index: {}]   ;;  %s1528_s5 = inlined_call_operand.vmem [shape: f32[256,128], index: 5, kind: input, shape index: {}, may-alias: {5,10}]   ;;  %s1529_s6 = inlined_call_operand.vmem [shape: f32[128,128], index: 6, kind: input, shape index: {}, may-alias: {6,11}]   ;;  %s1530_s7 = inlined_call_operand.vmem [shape: f32[2,128], index: 7, kind: input, shape index: {}, may-alias: {7,12}]   ;;  %s1531_s8 = inlined_call_operand.vmem [shape: f32[128,128], index: 8, kind: input, shape index: {}, may-alias: {8,13}]   ;;  %s1532_s9 = inlined_call_operand.<no memory space> [shape: s32[1], index: 9, kind: input, shape index: {}]   ;;  %s1533_s10 = inlined_call_operand.vmem [shape: f32[256,128], index: 10, kind: output, shape index: {0}, may-alias: {5,10}]   ;;  %s1534_s11 = inlined_call_operand.vmem [shape: f32[128,128], index: 11, kind: output, shape index: {1}, may-alias: {6,11}]   ;;  %s1535_s12 = inlined_call_operand.vmem [shape: f32[2,128], index: 12, kind: output, shape index: {2}, may-alias: {7,12}]   ;;  %s1536_s13 = inlined_call_operand.vmem [shape: f32[128,128], index: 13, kind: output, shape index: {3}, may-alias: {8,13}]   ;;  %s1537_s14 = inlined_call_operand.hbm [shape: f32[1,1], index: 14, kind: output, shape index: {4}]  }
   0x1   :  { %v839_v0 = vld [vmem:[%s1531_s8] sm:$0xff]  ;;  %v844_v1 = vld [vmem:[%s1531_s8 + $0x8] sm:$0xff]  ;;  %v849_v2 = vld [vmem:[%s1531_s8 + $0x10] sm:$0xff] }
   0x2   :  { %v854_v3 = vld [vmem:[%s1531_s8 + $0x18] sm:$0xff]  ;;  %v859_v4 = vld [vmem:[%s1531_s8 + $0x20] sm:$0xff]  ;;  %v864_v5 = vld [vmem:[%s1531_s8 + $0x28] sm:$0xff] }
   0x3   :  { %v869_v6 = vld [vmem:[%s1531_s8 + $0x30] sm:$0xff]  ;;  %v874_v7 = vld [vmem:[%s1531_s8 + $0x38] sm:$0xff]  ;;  %v879_v8 = vld [vmem:[%s1531_s8 + $0x40] sm:$0xff] }
   0x4   :  { %v884_v9 = vld [vmem:[%s1531_s8 + $0x48] sm:$0xff]  ;;  %v889_v10 = vld [vmem:[%s1531_s8 + $0x50] sm:$0xff]  ;;  %v894_v11 = vld [vmem:[%s1531_s8 + $0x58] sm:$0xff] }
   0x5   :  { %v899_v12 = vld [vmem:[%s1531_s8 + $0x60] sm:$0xff]  ;;  %v904_v13 = vld [vmem:[%s1531_s8 + $0x68] sm:$0xff]  ;;  %v909_v14 = vld [vmem:[%s1531_s8 + $0x70] sm:$0xff] }
   0x6   :  { %v914_v15 = vld [vmem:[%s1531_s8 + $0x78] sm:$0xff]  ;;  %v102_v16 = vld [vmem:[%s1525_s2 + $0x70] sm:$0xff]  ;;  %v931_v22 = vld [vmem:[%s1525_s2 + $0x60] sm:$0xff] }
   0x7   :  { %v103_v17 = vld [vmem:[%s1525_s2 + $0x78] sm:$0xff]  ;;  %v151_v18 = vld [vmem:[%s1528_s5 + $0x70] sm:$0xff]  ;;  %v215_v21 = vmul.f32 0.01, %v102_v16  ;;  %v936_v25 = vld [vmem:[%s1525_s2 + $0x68] sm:$0xff] }
   0x8   :  { %v152_v19 = vld [vmem:[%s1528_s5 + $0x78] sm:$0xff]  ;;  %v183_v20 = vmul.f32 0.99, %v151_v18  ;;  %v216_v24 = vmul.f32 0.01, %v103_v17  ;;  %v149_v26 = vld [vmem:[%s1528_s5 + $0x60] sm:$0xff]  ;;  %v402_v60 = vpack.c.bf16 %v103_v17, %v102_v16 }
   0x9   :  { %v184_v23 = vmul.f32 0.99, %v152_v19  ;;  %v150_v28 = vld [vmem:[%s1528_s5 + $0x68] sm:$0xff]  ;;  %v181_v29 = vmul.f32 0.99, %v149_v26  ;;  %v948_v31 = vld [vmem:[%s1525_s2 + $0x50] sm:$0xff] }
   0xa   :  { %v247_v27 = vadd.f32 %v215_v21, %v183_v20  ;;  %v213_v30 = vmul.f32 0.01, %v931_v22  ;;  %v182_v33 = vmul.f32 0.99, %v150_v28  ;;  %v214_v34 = vmul.f32 0.01, %v936_v25  ;;  %420 = vmatpush.bf16.msra.mxu0 %v402_v60 }
   0xb   :  { %v248_v32 = vadd.f32 %v216_v24, %v184_v23  ;;  %v954_v35 = vld [vmem:[%s1525_s2 + $0x58] sm:$0xff]  ;;  %v147_v36 = vld [vmem:[%s1528_s5 + $0x50] sm:$0xff]  ;;  %v211_v40 = vmul.f32 0.01, %v948_v31  ;;  %v973_v45 = vld [vmem:[%s1525_s2 + $0x40] sm:$0xff] }
   0xc   :  { %347 = vst [vmem:[%s1533_s10 + $0x70] sm:$0xff] %v247_v27  ;;  %v245_v37 = vadd.f32 %v213_v30, %v181_v29  ;;  %v179_v39 = vmul.f32 0.99, %v147_v36  ;;  %v246_v42 = vadd.f32 %v214_v34, %v182_v33  ;;  %v212_v44 = vmul.f32 0.01, %v954_v35  ;;  %v981_v47 = vld [vmem:[%s1525_s2 + $0x48] sm:$0xff] }
   0xd   :  { %v403_v41 = vpack.c.bf16 %v248_v32, %v247_v27  ;;  %v209_v50 = vmul.f32 0.01, %v973_v45  ;;  %v996_v55 = vld [vmem:[%s1525_s2 + $0x30] sm:$0xff]  ;;  %v210_v56 = vmul.f32 0.01, %v981_v47  ;;  %v1005_v57 = vld [vmem:[%s1525_s2 + $0x38] sm:$0xff] }
   0xe   :  { %v243_v46 = vadd.f32 %v211_v40, %v179_v39  ;;  %v401_v51 = vpack.c.bf16 %v246_v42, %v245_v37  ;;  %v1019_v18 = vld [vmem:[%s1525_s2 + $0x20] sm:$0xff]  ;;  %v207_v20 = vmul.f32 0.01, %v996_v55  ;;  %v208_v21 = vmul.f32 0.01, %v1005_v57  ;;  %v1026_v16 = vld [vmem:[%s1525_s2 + $0x28] sm:$0xff] }
   0xf   :  { %446 = vmatpush.bf16.msra.mxu3 %v403_v41  ;;  %v205_v27 = vmul.f32 0.01, %v1019_v18  ;;  %v1046_v30 = vld [vmem:[%s1525_s2 + $0x10] sm:$0xff]  ;;  %v206_v36 = vmul.f32 0.01, %v1026_v16  ;;  %v1063_v39 = vld [vmem:[%s1525_s2] sm:$0xff]  ;;  %v400_v40 = vpack.c.bf16 %v936_v25, %v931_v22 }
  0x11   :  { %421 = vmatpush.bf16.msra.mxu0 %v400_v40 }
  0x13   :  { %v148_v38 = vld [vmem:[%s1528_s5 + $0x58] sm:$0xff]  ;;  %447 = vmatpush.bf16.msra.mxu3 %v401_v51 }
  0x14   :  { %348 = vst [vmem:[%s1533_s10 + $0x78] sm:$0xff] %v248_v32  ;;  %v180_v43 = vmul.f32 0.99, %v148_v38  ;;  %v1051_v32 = vld [vmem:[%s1525_s2 + $0x18] sm:$0xff] }
  0x15   :  { %345 = vst [vmem:[%s1533_s10 + $0x60] sm:$0xff] %v245_v37  ;;  %v204_v25 = vmul.f32 0.01, %v1051_v32 }
  0x16   :  { %v244_v52 = vadd.f32 %v212_v44, %v180_v43  ;;  %v203_v43 = vmul.f32 0.01, %v1046_v30  ;;  %v1077_v44 = vld [vmem:[%s1525_s2 + $0x8] sm:$0xff] }
  0x17   :  { %v202_v60 = vmul.f32 0.01, %v1077_v44 }
  0x18   :  { %v399_v23 = vpack.c.bf16 %v244_v52, %v243_v46 }
  0x1a   :  { %448 = vmatpush.bf16.msra.mxu3 %v399_v23  ;;  %v117_v23 = vld [vmem:[%s1525_s2 + $0xe8] sm:$0xff] }
  0x1c   :  { %v145_v48 = vld [vmem:[%s1528_s5 + $0x40] sm:$0xff]  ;;  %v146_v49 = vld [vmem:[%s1528_s5 + $0x48] sm:$0xff] }
  0x1d   :  { %346 = vst [vmem:[%s1533_s10 + $0x68] sm:$0xff] %v246_v42  ;;  %v177_v53 = vmul.f32 0.99, %v145_v48  ;;  %v178_v54 = vmul.f32 0.99, %v146_v49 }
  0x1e   :  { %343 = vst [vmem:[%s1533_s10 + $0x50] sm:$0xff] %v243_v46 }
  0x1f   :  { %v241_v61 = vadd.f32 %v209_v50, %v177_v53  ;;  %v242_v19 = vadd.f32 %v210_v56, %v178_v54  ;;  %v118_v50 = vld [vmem:[%s1525_s2 + $0xf0] sm:$0xff]  ;;  %v119_v54 = vld [vmem:[%s1525_s2 + $0xf8] sm:$0xff]  ;;  %v398_v56 = vpack.c.bf16 %v954_v35, %v948_v31 }
  0x21   :  { %v397_v46 = vpack.c.bf16 %v242_v19, %v241_v61  ;;  %422 = vmatpush.bf16.msra.mxu0 %v398_v56 }
  0x23   :  { %449 = vmatpush.bf16.msra.mxu3 %v397_v46 }
  0x25   :  { %v143_v58 = vld [vmem:[%s1528_s5 + $0x30] sm:$0xff]  ;;  %v144_v59 = vld [vmem:[%s1528_s5 + $0x38] sm:$0xff] }
  0x26   :  { %344 = vst [vmem:[%s1533_s10 + $0x58] sm:$0xff] %v244_v52  ;;  %v175_v62 = vmul.f32 0.99, %v143_v58  ;;  %v176_v63 = vmul.f32 0.99, %v144_v59 }
  0x27   :  { %v201_v59 = vmul.f32 0.01, %v1063_v39 }
  0x28   :  { %v1041_v28 = vadd.f32 %v207_v20, %v175_v62  ;;  %v240_v34 = vadd.f32 %v208_v21, %v176_v63  ;;  %v231_v62 = vmul.f32 0.01, %v118_v50  ;;  %v418_v63 = vpack.c.bf16 %v119_v54, %v118_v50 }
  0x2a   :  { %433 = vmatpush.bf16.msra.mxu1 %v418_v63 }
  0x2d   :  { %v141_v17 = vld [vmem:[%s1528_s5 + $0x20] sm:$0xff] }
  0x2e   :  { %341 = vst [vmem:[%s1533_s10 + $0x40] sm:$0xff] %v241_v61  ;;  %v173_v26 = vmul.f32 0.99, %v141_v17  ;;  %v116_v17 = vld [vmem:[%s1525_s2 + $0xe0] sm:$0xff] }
  0x30   :  { %v1071_v41 = vadd.f32 %v205_v27, %v173_v26  ;;  %v232_v27 = vmul.f32 0.01, %v119_v54 }
  0x35   :  { %v142_v24 = vld [vmem:[%s1528_s5 + $0x28] sm:$0xff] }
  0x36   :  { %342 = vst [vmem:[%s1533_s10 + $0x48] sm:$0xff] %v242_v19  ;;  %v174_v29 = vmul.f32 0.99, %v142_v24  ;;  %v395_v19 = vpack.c.bf16 %v240_v34, %v1041_v28 }
  0x38   :  { %v1082_v22 = vadd.f32 %v206_v36, %v174_v29 }
  0x3d   :  { %v139_v33 = vld [vmem:[%s1528_s5 + $0x10] sm:$0xff]  ;;  %v140_v37 = vld [vmem:[%s1528_s5 + $0x18] sm:$0xff] }
  0x3e   :  { %v171_v38 = vmul.f32 0.99, %v139_v33  ;;  %339 = vst [vmem:[%s1533_s10 + $0x30] sm:$0xff] %v1041_v28  ;;  %v172_v42 = vmul.f32 0.99, %v140_v37  ;;  %v416_v33 = vpack.c.bf16 %v117_v23, %v116_v17 }
  0x3f   :  { %340 = vst [vmem:[%s1533_s10 + $0x38] sm:$0xff] %v240_v34  ;;  %v229_v37 = vmul.f32 0.01, %v116_v17 }
  0x40   :  { %v1098_v51 = vadd.f32 %v203_v43, %v171_v38  ;;  %v1109_v58 = vadd.f32 %v204_v25, %v172_v42  ;;  %v230_v38 = vmul.f32 0.01, %v117_v23 }
  0x46   :  { %v137_v48 = vld [vmem:[%s1528_s5] sm:$0xff]  ;;  %v138_v49 = vld [vmem:[%s1528_s5 + $0x8] sm:$0xff] }
  0x47   :  { %337 = vst [vmem:[%s1533_s10 + $0x20] sm:$0xff] %v1071_v41  ;;  %v169_v52 = vmul.f32 0.99, %v137_v48  ;;  %v170_v53 = vmul.f32 0.99, %v138_v49 }
  0x48   :  { %338 = vst [vmem:[%s1533_s10 + $0x28] sm:$0xff] %v1082_v22 }
  0x49   :  { %v1128_v20 = vadd.f32 %v201_v59, %v169_v52  ;;  %v1139_v26 = vadd.f32 %v202_v60, %v170_v53 }
  0x4f   :  { %v167_v61 = vld [vmem:[%s1528_s5 + $0xf0] sm:$0xff] }
  0x50   :  { %335 = vst [vmem:[%s1533_s10 + $0x10] sm:$0xff] %v1098_v51  ;;  %v199_v35 = vmul.f32 0.99, %v167_v61 }
  0x52   :  { %v1148_v34 = vadd.f32 %v231_v62, %v199_v35 }
  0x57   :  { %v168_v31 = vld [vmem:[%s1528_s5 + $0xf8] sm:$0xff] }
  0x58   :  { %336 = vst [vmem:[%s1533_s10 + $0x18] sm:$0xff] %v1109_v58  ;;  %v200_v21 = vmul.f32 0.99, %v168_v31 }
  0x5a   :  { %v1154_v40 = vadd.f32 %v232_v27, %v200_v21 }
  0x5f   :  { %v165_v24 = vld [vmem:[%s1528_s5 + $0xe0] sm:$0xff]  ;;  %v166_v28 = vld [vmem:[%s1528_s5 + $0xe8] sm:$0xff] }
  0x60   :  { %v197_v29 = vmul.f32 0.99, %v165_v24  ;;  %333 = vst [vmem:[%s1533_s10] sm:$0xff] %v1128_v20  ;;  %v198_v36 = vmul.f32 0.99, %v166_v28 }
  0x61   :  { %334 = vst [vmem:[%s1533_s10 + $0x8] sm:$0xff] %v1139_v26 }
  0x62   :  { %87 = vsyncadd [#allocation4], 2048  ;;  %v114_v42 = vld [vmem:[%s1525_s2 + $0xd0] sm:$0xff]  ;;  %v396_v43 = vpack.c.bf16 %v981_v47, %v973_v45  ;;  %450 = vmatpush.bf16.msra.mxu3 %v395_v19  ;;  %v393_v46 = vpack.c.bf16 %v1082_v22, %v1071_v41  ;;  %363 = vst [vmem:[%s1533_s10 + $0xf0] sm:$0xff] %v1148_v34  ;;  %v1167_v25 = vadd.f32 %v229_v37, %v197_v29  ;;  %v115_v48 = vld [vmem:[%s1525_s2 + $0xd8] sm:$0xff] }
  0x63   :  { %v227_v47 = vmul.f32 0.01, %v114_v42  ;;  %v1182_v41 = vadd.f32 %v230_v38, %v198_v36  ;;  %434 = vmatpush.bf16.msra.mxu1 %v416_v33  ;;  %v112_v52 = vld [vmem:[%s1525_s2 + $0xc0] sm:$0xff]  ;;  %v414_v53 = vpack.c.bf16 %v115_v48, %v114_v42  ;;  %v228_v54 = vmul.f32 0.01, %v115_v48  ;;  %v113_v56 = vld [vmem:[%s1525_s2 + $0xc8] sm:$0xff] }
  0x64   :  { %423 = vmatpush.bf16.msra.mxu0 %v396_v43  ;;  %v394_v61 = vpack.c.bf16 %v1005_v57, %v996_v55  ;;  %v1211_v63 = vld [vmem:[%s1525_s2 + $0xb0] sm:$0xff]  ;;  %v391_v19 = vpack.c.bf16 %v1109_v58, %v1098_v51  ;;  %v225_v55 = vmul.f32 0.01, %v112_v52  ;;  %v226_v57 = vmul.f32 0.01, %v113_v56  ;;  %v111_v17 = vld [vmem:[%s1525_s2 + $0xb8] sm:$0xff] }
  0x65   :  { %v223_v24 = vmul.f32 0.01, %v1211_v63  ;;  %v412_v27 = vpack.c.bf16 %v113_v56, %v112_v52  ;;  %v392_v28 = vpack.c.bf16 %v1026_v16, %v1019_v18  ;;  %v382_v29 = vld [vmem:[%s1523_s0] sm:$0xff]  ;;  %v109_v16 = vld [vmem:[%s1525_s2 + $0xa8] sm:$0xff]  ;;  %v389_v42 = vpack.c.bf16 %v1139_v26, %v1128_v20 }
  0x66   :  { %451 = vmatpush.bf16.msra.mxu3 %v393_v46  ;;  %v384_v33 = vld [vmem:[%s1524_s1] sm:$0xff]  ;;  %v224_v46 = vmul.f32 0.01, %v111_v17 }
  0x67   :  { %435 = vmatpush.bf16.msra.mxu1 %v414_v53  ;;  %v108_v18 = vld [vmem:[%s1525_s2 + $0xa0] sm:$0xff] }
  0x68   :  { %424 = vmatpush.bf16.msra.mxu0 %v394_v61  ;;  %v104_v56 = vld [vmem:[%s1525_s2 + $0x80] sm:$0xff] }
  0x69   :  { %v163_v49 = vld [vmem:[%s1528_s5 + $0xd0] sm:$0xff]  ;;  %v164_v45 = vld [vmem:[%s1528_s5 + $0xd8] sm:$0xff] }
  0x6a   :  { %364 = vst [vmem:[%s1533_s10 + $0xf8] sm:$0xff] %v1154_v40  ;;  %v195_v22 = vmul.f32 0.99, %v163_v49  ;;  %v196_v50 = vmul.f32 0.99, %v164_v45  ;;  %v106_v45 = vld [vmem:[%s1525_s2 + $0x90] sm:$0xff]  ;;  %452 = vmatpush.bf16.msra.mxu3 %v391_v19 }
  0x6b   :  { %361 = vst [vmem:[%s1533_s10 + $0xe0] sm:$0xff] %v1167_v25  ;;  %436 = vmatpush.bf16.msra.mxu1 %v412_v27 }
  0x6c   :  { %v1206_v31 = vadd.f32 %v227_v47, %v195_v22  ;;  %v1215_v21 = vadd.f32 %v228_v54, %v196_v50  ;;  %v419_v47 = vpack.c.bf16 %v1154_v40, %v1148_v34  ;;  %v221_v22 = vmul.f32 0.01, %v108_v18  ;;  %v107_v50 = vld [vmem:[%s1525_s2 + $0x98] sm:$0xff]  ;;  %425 = vmatpush.bf16.msra.mxu0 %v392_v28 }
  0x6d   :  { %v222_v34 = vmul.f32 0.01, %v109_v16  ;;  %v410_v40 = vpack.c.bf16 %v111_v17, %v1211_v63  ;;  %v386_v63 = vpack.c.bf16 %v384_v33, %v382_v29  ;;  %v388_v33 = vpack.c.bf16 %v1077_v44, %v1063_v39 }
  0x6e   :  { %453 = vmatpush.bf16.msra.mxu3 %v389_v42  ;;  %v406_v39 = vpack.c.bf16 %v107_v50, %v106_v45 }
  0x6f   :  { %437 = vmatpush.bf16.msra.mxu1 %v410_v40  ;;  %v277_v40 = vld [vmem:[%s1529_s6 + $0x60] sm:$0xff] }
  0x71   :  { %454 = vmatmul.bf16.vlgmr.msra.gmra.mxu3 %v386_v63 }
  0x72   :  { %v161_v59 = vld [vmem:[%s1528_s5 + $0xc0] sm:$0xff]  ;;  %v162_v60 = vld [vmem:[%s1528_s5 + $0xc8] sm:$0xff]  ;;  %459 = vmatpush.bf16.msrb.mxu3 %v419_v47 }
  0x73   :  { %362 = vst [vmem:[%s1533_s10 + $0xe8] sm:$0xff] %v1182_v41  ;;  %v193_v35 = vmul.f32 0.99, %v161_v59  ;;  %v194_v62 = vmul.f32 0.99, %v162_v60 }
  0x75   :  { %v1243_v36 = vadd.f32 %v225_v55, %v193_v35  ;;  %v1256_v43 = vadd.f32 %v226_v57, %v194_v62  ;;  %v105_v35 = vld [vmem:[%s1525_s2 + $0x88] sm:$0xff]  ;;  %v390_v62 = vpack.c.bf16 %v1051_v32, %v1046_v30  ;;  %v219_v55 = vmul.f32 0.01, %v106_v45 }
  0x76   :  { %v220_v57 = vmul.f32 0.01, %v107_v50  ;;  %v218_v29 = vmul.f32 0.01, %v105_v35 }
  0x77   :  { %426 = vmatpush.bf16.msra.mxu0 %v390_v62  ;;  %v413_v44 = vpack.c.bf16 %v1256_v43, %v1243_v36  ;;  %v293_v62 = vmul.f32 0.99, %v277_v40 }
  0x7a   :  { %v159_v23 = vld [vmem:[%s1528_s5 + $0xb0] sm:$0xff] }
  0x7b   :  { %359 = vst [vmem:[%s1533_s10 + $0xd0] sm:$0xff] %v1206_v31  ;;  %v191_v58 = vmul.f32 0.99, %v159_v23  ;;  %v217_v23 = vmul.f32 0.01, %v104_v56  ;;  %427 = vmatpush.bf16.msra.mxu0 %v388_v33 }
  0x7d   :  { %v1270_v20 = vadd.f32 %v223_v24, %v191_v58  ;;  %v408_v24 = vpack.c.bf16 %v109_v16, %v108_v18  ;;  %v404_v18 = vpack.c.bf16 %v105_v35, %v104_v56 }
  0x7e   :  { %428 = vmatmul.bf16.vlgmr.msra.gmra.mxu0 %v386_v63 }
  0x7f   :  { %438 = vmatpush.bf16.msra.mxu1 %v408_v24 }
  0x82   :  { %v160_v51 = vld [vmem:[%s1528_s5 + $0xb8] sm:$0xff] }
  0x83   :  { %360 = vst [vmem:[%s1533_s10 + $0xd8] sm:$0xff] %v1215_v21  ;;  %v192_v37 = vmul.f32 0.99, %v160_v51  ;;  %v417_v51 = vpack.c.bf16 %v1182_v41, %v1167_v25  ;;  %439 = vmatpush.bf16.msra.mxu1 %v406_v39 }
  0x85   :  { %v256_v52 = vadd.f32 %v224_v46, %v192_v37  ;;  %460 = vmatpush.bf16.msrb.mxu3 %v417_v51  ;;  %v415_v37 = vpack.c.bf16 %v1215_v21, %v1206_v31  ;;  %v383_v31 = vld [vmem:[%s1523_s0 + $0x8] sm:$0xff]  ;;  %v134_v46 = vld [vmem:[%s1526_s3 + $0x70] sm:$0xff] }
  0x86   :  { %v385_v21 = vld [vmem:[%s1524_s1 + $0x8] sm:$0xff]  ;;  %v311_v45 = vmul.f32 0.01, %v134_v46 }
  0x87   :  { %v411_v16 = vpack.c.bf16 %v256_v52, %v1270_v20  ;;  %440 = vmatpush.bf16.msra.mxu1 %v404_v18 }
  0x89   :  { %461 = vmatpush.bf16.msrb.mxu3 %v415_v37 }
  0x8a   :  { %v157_v38 = vld [vmem:[%s1528_s5 + $0xa0] sm:$0xff]  ;;  %v158_v48 = vld [vmem:[%s1528_s5 + $0xa8] sm:$0xff] }
  0x8b   :  { %v189_v49 = vmul.f32 0.99, %v157_v38  ;;  %357 = vst [vmem:[%s1533_s10 + $0xc0] sm:$0xff] %v1243_v36  ;;  %v190_v26 = vmul.f32 0.99, %v158_v48  ;;  %v387_v38 = vpack.c.bf16 %v385_v21, %v383_v31  ;;  %v135_v48 = vld [vmem:[%s1526_s3 + $0x78] sm:$0xff] }
  0x8c   :  { %358 = vst [vmem:[%s1533_s10 + $0xc8] sm:$0xff] %v1256_v43  ;;  %v312_v47 = vmul.f32 0.01, %v135_v48 }
  0x8d   :  { %v253_v59 = vadd.f32 %v221_v22, %v189_v49  ;;  %v254_v19 = vadd.f32 %v222_v34, %v190_v26  ;;  %462 = vmatpush.bf16.msrb.mxu3 %v413_v44  ;;  %441 = vmatmul.bf16.vlgmr.msra.gmra.mxu1 %v387_v38  ;;  %v279_v49 = vld [vmem:[%s1529_s6 + $0x70] sm:$0xff]  ;;  %v280_v26 = vld [vmem:[%s1529_s6 + $0x78] sm:$0xff]  ;;  %v132_v22 = vld [vmem:[%s1526_s3 + $0x60] sm:$0xff] }
  0x8e   :  { %v295_v50 = vmul.f32 0.99, %v279_v49  ;;  %v133_v34 = vld [vmem:[%s1526_s3 + $0x68] sm:$0xff]  ;;  %v127_v49 = vld [vmem:[%s1526_s3 + $0x38] sm:$0xff] }
  0x8f   :  { %v409_v42 = vpack.c.bf16 %v254_v19, %v253_v59  ;;  %v491_v56 = vpack.c.bf16 %v133_v34, %v132_v22 }
  0x91   :  { %463 = vmatpush.bf16.msrb.mxu3 %v411_v16 }
  0x93   :  { %v155_v53 = vld [vmem:[%s1528_s5 + $0x90] sm:$0xff]  ;;  %v156_v54 = vld [vmem:[%s1528_s5 + $0x98] sm:$0xff] }
  0x94   :  { %355 = vst [vmem:[%s1533_s10 + $0xb0] sm:$0xff] %v1270_v20  ;;  %v187_v60 = vmul.f32 0.99, %v155_v53  ;;  %v188_v61 = vmul.f32 0.99, %v156_v54  ;;  %v493_v20 = vpack.c.bf16 %v135_v48, %v134_v46  ;;  %v126_v48 = vld [vmem:[%s1526_s3 + $0x30] sm:$0xff] }
  0x95   :  { %356 = vst [vmem:[%s1533_s10 + $0xb8] sm:$0xff] %v256_v52  ;;  %464 = vmatpush.bf16.msrb.mxu3 %v409_v42  ;;  %v296_v52 = vmul.f32 0.99, %v280_v26  ;;  %v309_v53 = vmul.f32 0.01, %v132_v22 }
  0x96   :  { %v251_v58 = vadd.f32 %v219_v55, %v187_v60  ;;  %v252_v27 = vadd.f32 %v220_v57, %v188_v61  ;;  %495 = vmatpush.bf16.msrb.mxu0 %v493_v20  ;;  %v310_v54 = vmul.f32 0.01, %v133_v34  ;;  %v130_v60 = vld [vmem:[%s1526_s3 + $0x50] sm:$0xff]  ;;  %v327_v61 = vadd.f32 %v311_v45, %v295_v50 }
  0x97   :  { %v328_v35 = vadd.f32 %v312_v47, %v296_v52  ;;  %v275_v55 = vld [vmem:[%s1529_s6 + $0x50] sm:$0xff]  ;;  %v307_v57 = vmul.f32 0.01, %v130_v60  ;;  %v325_v51 = vadd.f32 %v309_v53, %v293_v62  ;;  %v303_v47 = vmul.f32 0.01, %v126_v48  ;;  %v124_v53 = vld [vmem:[%s1526_s3 + $0x20] sm:$0xff] }
  0x98   :  { %v407_v36 = vpack.c.bf16 %v252_v27, %v251_v58  ;;  %v291_v24 = vmul.f32 0.99, %v275_v55  ;;  %v304_v20 = vmul.f32 0.01, %v127_v49 }
  0x9a   :  { %465 = vmatpush.bf16.msrb.mxu3 %v407_v36  ;;  %496 = vmatpush.bf16.msrb.mxu0 %v491_v56  ;;  %v323_v39 = vadd.f32 %v307_v57, %v291_v24  ;;  %v329_v57 = vld [vmem:[%s1530_s7] sm:$0x3] }
  0x9c   :  { %v153_v17 = vld [vmem:[%s1528_s5 + $0x80] sm:$0xff] }
  0x9d   :  { %353 = vst [vmem:[%s1533_s10 + $0xa0] sm:$0xff] %v253_v59  ;;  %v185_v32 = vmul.f32 0.99, %v153_v17  ;;  %v278_v59 = vld [vmem:[%s1529_s6 + $0x68] sm:$0xff] }
  0x9e   :  { %v294_v63 = vmul.f32 0.99, %v278_v59  ;;  %v485_v59 = vpack.c.bf16 %v127_v49, %v126_v48 }
  0x9f   :  { %v249_v25 = vadd.f32 %v217_v23, %v185_v32  ;;  %v128_v32 = vld [vmem:[%s1526_s3 + $0x40] sm:$0xff]  ;;  %v494_v23 = vpack.c.bf16 %v328_v35, %v327_v61 }
  0xa1   :  { %508 = vmatpush.bf16.msrb.mxu1 %v494_v23  ;;  %v330_v23 = vmul.f32 0.99, %v329_v57 }
  0xa4   :  { %v154_v30 = vld [vmem:[%s1528_s5 + $0x88] sm:$0xff] }
  0xa5   :  { %354 = vst [vmem:[%s1533_s10 + $0xa8] sm:$0xff] %v254_v19  ;;  %v186_v28 = vmul.f32 0.99, %v154_v30  ;;  %v131_v19 = vld [vmem:[%s1526_s3 + $0x58] sm:$0xff] }
  0xa6   :  { %351 = vst [vmem:[%s1533_s10 + $0x90] sm:$0xff] %v251_v58  ;;  %v308_v17 = vmul.f32 0.01, %v131_v19  ;;  %v276_v30 = vld [vmem:[%s1529_s6 + $0x58] sm:$0xff]  ;;  %v326_v58 = vadd.f32 %v310_v54, %v294_v63  ;;  %v489_v33 = vpack.c.bf16 %v131_v19, %v130_v60  ;;  %v125_v54 = vld [vmem:[%s1526_s3 + $0x28] sm:$0xff] }
  0xa7   :  { %352 = vst [vmem:[%s1533_s10 + $0x98] sm:$0xff] %v252_v27  ;;  %v250_v41 = vadd.f32 %v218_v29, %v186_v28  ;;  %v129_v27 = vld [vmem:[%s1526_s3 + $0x48] sm:$0xff]  ;;  %v301_v60 = vmul.f32 0.01, %v124_v53  ;;  %v483_v55 = vpack.c.bf16 %v125_v54, %v124_v53 }
  0xa8   :  { %349 = vst [vmem:[%s1533_s10 + $0x80] sm:$0xff] %v249_v25  ;;  %v492_v37 = vpack.c.bf16 %v326_v58, %v325_v51  ;;  %v306_v44 = vmul.f32 0.01, %v129_v27  ;;  %497 = vmatpush.bf16.msrb.mxu0 %v489_v33 }
  0xa9   :  { %350 = vst [vmem:[%s1533_s10 + $0x88] sm:$0xff] %v250_v41  ;;  %v405_v43 = vpack.c.bf16 %v250_v41, %v249_v25  ;;  %v292_v25 = vmul.f32 0.99, %v276_v30  ;;  %v305_v41 = vmul.f32 0.01, %v128_v32 }
  0xaa   :  { %379 = vst [vmem:[%s1534_s11 + $0x70] sm:$0xff] %v327_v61  ;;  %509 = vmatpush.bf16.msrb.mxu1 %v492_v37  ;;  %v302_v61 = vmul.f32 0.01, %v125_v54 }
  0xab   :  { %466 = vmatpush.bf16.msrb.mxu3 %v405_v43  ;;  %v324_v31 = vadd.f32 %v308_v17, %v292_v25  ;;  %v1415_v43 = vld [vmem:[%s1527_s4] sm:$0x3] }
  0xac   :  { %v331_v52 = vmul.f32 0.01, %v1415_v43  ;;  %v521_v57 = vperm.slane %v1415_v43, 1 }
  0xad   :  { %v490_v36 = vpack.c.bf16 %v324_v31, %v323_v39 }
  0xae   :  { %467 = vmatmul.bf16.vlgmr.msrb.gmra.mxu3 %v387_v38  ;;  %v487_v38 = vpack.c.bf16 %v129_v27, %v128_v32 }
  0xaf   :  { %510 = vmatpush.bf16.msrb.mxu1 %v490_v36 }
  0xb0   :  { %498 = vmatpush.bf16.msrb.mxu0 %v487_v38 }
  0xb1   :  { %v273_v28 = vld [vmem:[%s1529_s6 + $0x40] sm:$0xff]  ;;  %v274_v29 = vld [vmem:[%s1529_s6 + $0x48] sm:$0xff] }
  0xb2   :  { %380 = vst [vmem:[%s1534_s11 + $0x78] sm:$0xff] %v328_v35  ;;  %v289_v18 = vmul.f32 0.99, %v273_v28  ;;  %v290_v21 = vmul.f32 0.99, %v274_v29 }
  0xb3   :  { %377 = vst [vmem:[%s1534_s11 + $0x60] sm:$0xff] %v325_v51  ;;  %v122_v51 = vld [vmem:[%s1526_s3 + $0x10] sm:$0xff] }
  0xb4   :  { %378 = vst [vmem:[%s1534_s11 + $0x68] sm:$0xff] %v326_v58  ;;  %v321_v16 = vadd.f32 %v305_v41, %v289_v18  ;;  %v322_v42 = vadd.f32 %v306_v44, %v290_v21  ;;  %499 = vmatpush.bf16.msrb.mxu0 %v485_v59  ;;  %v123_v58 = vld [vmem:[%s1526_s3 + $0x18] sm:$0xff]  ;;  %v299_v28 = vmul.f32 0.01, %v122_v51  ;;  %v332_v41 = vadd.f32 %v331_v52, %v330_v23  ;;  %v121_v21 = vld [vmem:[%s1526_s3 + $0x8] sm:$0xff] }
  0xb5   :  { %375 = vst [vmem:[%s1534_s11 + $0x50] sm:$0xff] %v323_v39  ;;  %v300_v29 = vmul.f32 0.01, %v123_v58  ;;  %v481_v38 = vpack.c.bf16 %v123_v58, %v122_v51  ;;  %v298_v36 = vmul.f32 0.01, %v121_v21 }
  0xb6   :  { %376 = vst [vmem:[%s1534_s11 + $0x58] sm:$0xff] %v324_v31  ;;  %v488_v46 = vpack.c.bf16 %v322_v42, %v321_v16  ;;  %v120_v31 = vld [vmem:[%s1526_s3] sm:$0xff]  ;;  %v523_v51 = vperm.slane %v332_v41, 1 }
  0xb7   :  { %373 = vst [vmem:[%s1534_s11 + $0x40] sm:$0xff] %v321_v16 }
  0xb8   :  { %374 = vst [vmem:[%s1534_s11 + $0x48] sm:$0xff] %v322_v42  ;;  %511 = vmatpush.bf16.msrb.mxu1 %v488_v46  ;;  %500 = vmatpush.bf16.msrb.mxu0 %v483_v55  ;;  %v297_v42 = vmul.f32 0.01, %v120_v31 }
  0xb9   :  { %381 = vst [vmem:[%s1535_s12] sm:$0x3] %v332_v41 }
  0xbc   :  { %501 = vmatpush.bf16.msrb.mxu0 %v481_v38 }
  0xbf   :  { %v271_v45 = vld [vmem:[%s1529_s6 + $0x30] sm:$0xff]  ;;  %v272_v26 = vld [vmem:[%s1529_s6 + $0x38] sm:$0xff]  ;;  %v269_v56 = vld [vmem:[%s1529_s6 + $0x20] sm:$0xff] }
  0xc0   :  { %v287_v22 = vmul.f32 0.99, %v271_v45  ;;  %v288_v50 = vmul.f32 0.99, %v272_v26  ;;  %v270_v35 = vld [vmem:[%s1529_s6 + $0x28] sm:$0xff] }
  0xc1   :  { %v285_v63 = vmul.f32 0.99, %v269_v56  ;;  %v286_v19 = vmul.f32 0.99, %v270_v35  ;;  %v472_v56 = vperm.slane %v1415_v43, 0 }
  0xc2   :  { %v319_v34 = vadd.f32 %v303_v47, %v287_v22  ;;  %v320_v40 = vadd.f32 %v304_v20, %v288_v50  ;;  %v479_v50 = vpack.c.bf16 %v121_v21, %v120_v31 }
  0xc3   :  { %v317_v30 = vadd.f32 %v301_v60, %v285_v63  ;;  %v318_v32 = vadd.f32 %v302_v61, %v286_v19  ;;  %v475_v60 = vperm.slane %v332_v41, 0 }
  0xc4   :  { %371 = vst [vmem:[%s1534_s11 + $0x30] sm:$0xff] %v319_v34  ;;  %v486_v62 = vpack.c.bf16 %v320_v40, %v319_v34  ;;  %502 = vmatpush.bf16.msrb.mxu0 %v479_v50 }
  0xc5   :  { %372 = vst [vmem:[%s1534_s11 + $0x38] sm:$0xff] %v320_v40  ;;  %v484_v25 = vpack.c.bf16 %v318_v32, %v317_v30 }
  0xc6   :  { %512 = vmatpush.bf16.msrb.mxu1 %v486_v62 }
  0xca   :  { %513 = vmatpush.bf16.msrb.mxu1 %v484_v25 }
  0xcc   :  { %v267_v24 = vld [vmem:[%s1529_s6 + $0x10] sm:$0xff]  ;;  %v268_v33 = vld [vmem:[%s1529_s6 + $0x18] sm:$0xff] }
  0xcd   :  { %369 = vst [vmem:[%s1534_s11 + $0x20] sm:$0xff] %v317_v30  ;;  %v283_v37 = vmul.f32 0.99, %v267_v24  ;;  %v284_v39 = vmul.f32 0.99, %v268_v33 }
  0xce   :  { %370 = vst [vmem:[%s1534_s11 + $0x28] sm:$0xff] %v318_v32 }
  0xcf   :  { %v315_v44 = vadd.f32 %v299_v28, %v283_v37  ;;  %v316_v18 = vadd.f32 %v300_v29, %v284_v39 }
  0xd1   :  { %v482_v48 = vpack.c.bf16 %v316_v18, %v315_v44 }
  0xd3   :  { %514 = vmatpush.bf16.msrb.mxu1 %v482_v48 }
  0xd5   :  { %v265_v16 = vld [vmem:[%s1529_s6] sm:$0xff]  ;;  %v266_v46 = vld [vmem:[%s1529_s6 + $0x8] sm:$0xff] }
  0xd6   :  { %367 = vst [vmem:[%s1534_s11 + $0x10] sm:$0xff] %v315_v44  ;;  %v281_v49 = vmul.f32 0.99, %v265_v16  ;;  %v282_v45 = vmul.f32 0.99, %v266_v46 }
  0xd7   :  { %368 = vst [vmem:[%s1534_s11 + $0x18] sm:$0xff] %v316_v18 }
  0xd8   :  { %v313_v20 = vadd.f32 %v297_v42, %v281_v49  ;;  %v314_v26 = vadd.f32 %v298_v36, %v282_v45 }
  0xda   :  { %365 = vst [vmem:[%s1534_s11] sm:$0xff] %v313_v20  ;;  %v480_v52 = vpack.c.bf16 %v314_v26, %v313_v20 }
  0xdb   :  { %366 = vst [vmem:[%s1534_s11 + $0x8] sm:$0xff] %v314_v26 }
  0xdc   :  { %515 = vmatpush.bf16.msrb.mxu1 %v480_v52 }
  0xf4   :  { %v455_v17 = vpop.f32.mrf.mxu3 }
  0xfb   :  { %v429_v27 = vpop.f32.mrf.mxu0 }
  0xfc   :  { %v456_v40 = vpop.f32.mrf.mxu3 }
 0x103   :  { %v431_v22 = vpop.f32.mrf.mxu0 }
 0x10a   :  { %v442_v47 = vpop.f32.mrf.mxu1 }
 0x10b   :  { %v443_v54 = vadd.f32 %v442_v47, %v429_v27 }
 0x10d   :  { %v473_v59 = vadd.f32 %v472_v56, %v443_v54 }
 0x10f   :  { %v474_v62 = vmax.f32 %v473_v59, 0.0 }
 0x112   :  { %v444_v34 = vpop.f32.mrf.mxu1 }
 0x131   :  { %v468_v53 = vpop.f32.mrf.mxu3 }
 0x139   :  { %v469_v61 = vpop.f32.mrf.mxu3 }
 0x13a   :  { %v470_v35 = vadd.f32 %v469_v61, %v456_v40 }
 0x13c   :  { %v476_v63 = vadd.f32 %v475_v60, %v470_v35 }
 0x13e   :  { %v477_v19 = vmax.f32 %v476_v63, 0.0 }
 0x140   :  { %v478_v55 = vpack.c.bf16 %v477_v19, %v474_v62 }
 0x142   :  { %503 = vmatmul.bf16.vlgmr.msrb.gmra.mxu0 %v478_v55  ;;  %516 = vmatmul.bf16.vlgmr.msrb.gmra.mxu1 %v478_v55 }
 0x1bf   :  { %v504_v17 = vpop.f32.mrf.mxu0  ;;  %v517_v30 = vpop.f32.mrf.mxu1 }
 0x1c0   :  { %v522_v32 = vadd.f32 %v521_v57, %v504_v17 }
 0x1c2   :  { %v525_v23 = vmul.f32 %v522_v32, %v522_v32 }
 0x1c4   :  { %526 = vadd.xlane.f32.xlu0 %v525_v23 }
 0x1c7   :  { %v506_v58 = vpop.f32.mrf.mxu0  ;;  %v518_v24 = vpop.f32.mrf.mxu1 }
 0x1c8   :  { %v524_v27 = vadd.f32 %v523_v51, %v518_v24 }
 0x1ca   :  { %v540_v28 = vmul.f32 %v524_v27, %v524_v27 }
 0x1cc   :  { %541 = vadd.xlane.f32.xlu0 %v540_v28 }
 0x237   :  { %v527_v29 = vpop.xlane.xlu0 %526 }
 0x238   :  { %v528_v33 = vmax.f32 %v527_v29, 1e-24 }
 0x23a   :  { %720 = vrsqrt.f32 %v528_v33  ;;  %vm535_vm1 = vweird.f32 %v528_v33 }
 0x23f   :  { %v542_v25 = vpop.xlane.xlu0 %541 }
 0x240   :  { %v721_v37 = vpop.eup %720  ;;  %v543_v39 = vmax.f32 %v542_v25, 1e-24 }
 0x241   :  { %v530_v44 = vmul.f32 %v721_v37, %v528_v33  ;;  %vm536_vm0 = vweird.f32 %v721_v37 }
 0x242   :  { %722 = vrsqrt.f32 %v543_v39  ;;  %vm537_vm2 = vmor %vm535_vm1, %vm536_vm0  ;;  %vm550_vm4 = vweird.f32 %v543_v39 }
 0x243   :  { %v531_v43 = vmul.f32 %v721_v37, %v530_v44 }
 0x245   :  { %v532_v18 = vmul.f32 0.5, %v531_v43 }
 0x247   :  { %v533_v31 = vsub.f32 1.5, %v532_v18 }
 0x248   :  { %v723_v21 = vpop.eup %722 }
 0x249   :  { %v534_v16 = vmul.f32 %v721_v37, %v533_v31  ;;  %v545_v41 = vmul.f32 %v723_v21, %v543_v39  ;;  %vm551_vm3 = vweird.f32 %v723_v21 }
 0x24a   :  { %vm552_vm5 = vmor %vm550_vm4, %vm551_vm3 }
 0x24b   :  { %v538_v38 = vsel %vm537_vm2, %v721_v37, %v534_v16  ;;  %v546_v42 = vmul.f32 %v723_v21, %v545_v41 }
 0x24c   :  { %v539_v36 = vmul.f32 %v538_v38, %v522_v32 }
 0x24d   :  { %v547_v46 = vmul.f32 0.5, %v546_v42 }
 0x24f   :  { %v548_v48 = vsub.f32 1.5, %v547_v46 }
 0x251   :  { %v549_v49 = vmul.f32 %v723_v21, %v548_v48 }
 0x253   :  { %v553_v45 = vsel %vm552_vm5, %v723_v21, %v549_v49 }
 0x254   :  { %v554_v47 = vmul.f32 %v553_v45, %v524_v27 }
 0x255   :  { %754 = dma.done.wait [#allocation4], 2048 }
 0x256   :  { %755 = vsyncadd [#allocation4], 4294965248  ;;  %s560_s7 = scalar_lea.vmem %s1536_s13, %s1532_s9 }
 0x257   :  { %589 = vst [vmem:[%s560_s7] sm:$0xff] %v554_v47 }
 0x258   :  { %595 = vsyncadd [#allocation4 + $0x1], 128  ;;  %v624_v20 = vpack.c.bf16 %v914_v15, %v909_v14  ;;  %v623_v26 = vpack.c.bf16 %v904_v13, %v899_v12  ;;  %v622_v22 = vpack.c.bf16 %v894_v11, %v889_v10  ;;  %v621_v50 = vpack.c.bf16 %v884_v9, %v879_v8 }
 0x259   :  { %v620_v52 = vpack.c.bf16 %v874_v7, %v869_v6  ;;  %v596_v34 = vmul.f32 %v554_v47, %v539_v36  ;;  %v619_v14 = vpack.c.bf16 %v864_v5, %v859_v4  ;;  %v618_v12 = vpack.c.bf16 %v854_v3, %v849_v2 }
 0x25a   :  { %625 = vmatpush.bf16.xpose.msra.mxu2 %v624_v20  ;;  %v617_v10 = vpack.c.bf16 %v844_v1, %v839_v0  ;;  %v600_v8 = vpack.c.bf16 %v539_v36, %v539_v36  ;;  %vm662_vm6 = vcmask 0  }
 0x25b   :  { %597 = vadd.xlane.f32.xlu0 %v596_v34 }
 0x262   :  { %626 = vmatpush.bf16.xpose.msra.mxu2 %v623_v26 }
 0x26a   :  { %627 = vmatpush.bf16.xpose.msra.mxu2 %v622_v22 }
 0x272   :  { %628 = vmatpush.bf16.xpose.msra.mxu2 %v621_v50 }
 0x27a   :  { %629 = vmatpush.bf16.xpose.msra.mxu2 %v620_v52 }
 0x282   :  { %630 = vmatpush.bf16.xpose.msra.mxu2 %v619_v14 }
 0x28a   :  { %631 = vmatpush.bf16.xpose.msra.mxu2 %v618_v12 }
 0x292   :  { %632 = vmatpush.bf16.xpose.msra.mxu2 %v617_v10 }
 0x299   :  { %633 = vmatmul.bf16.vlgmr.msra.gmra.mxu2 %v600_v8 }
 0x2ce   :  { %v598_v7 = vpop.xlane.xlu0 %597 }
 0x2cf   :  { %v599_v13 = vmul.f32 10.0, %v598_v7 }
 0x31c   :  { %v634_v9 = vpop.f32.mrf.mxu2 }
 0x31d   :  { %v638_v11 = vmul.f32 10.0, %v634_v9 }
 0x31f   :  { %639 = vmax.xlane.f32.xlu0 %v638_v11 }
 0x324   :  { %v636_v6 = vpop.f32.mrf.mxu2 }
 0x392   :  { %v640_v15 = vpop.xlane.xlu0 %639 }
 0x393   :  { %v641_v40 = vmax.f32 %v599_v13, %v640_v15 }
 0x395   :  { %v645_v4 = vsub.f32 %v638_v11, %v641_v40  ;;  %v642_v2 = vsub.f32 %v599_v13, %v641_v40 }
 0x397   :  { %v646_v5 = vmul.f32 1.442695, %v645_v4  ;;  %v643_v3 = vmul.f32 1.442695, %v642_v2 }
 0x399   :  { %724 = vpow2.f32 %v646_v5 }
 0x39a   :  { %726 = vpow2.f32 %v643_v3 }
 0x39f   :  { %v725_v53 = vpop.eup %724 }
 0x3a0   :  { %648 = vadd.xlane.f32.xlu1 %v725_v53  ;;  %v727_v0 = vpop.eup %726 }
 0x413   :  { %v649_v1 = vpop.xlane.xlu1 %648 }
 0x414   :  { %v650_v54 = vadd.f32 %v727_v0, %v649_v1 }
 0x416   :  { %728 = vlog2.f32 %v650_v54 }
 0x41c   :  { %v729_v56 = vpop.eup %728 }
 0x41d   :  { %v652_v59 = vmul.f32 0.6931472, %v729_v56 }
 0x41f   :  { %v653_v60 = vadd.f32 %v652_v59, %v641_v40 }
 0x421   :  { %v654_v61 = vsub.f32 %v653_v60, %v599_v13 }
 0x423   :  { %v655_v35 = vrot.slane %v654_v61, 4 }
 0x425   :  { %v656_v62 = vadd.f32 %v655_v35, %v654_v61 }
 0x427   :  { %v657_v63 = vrot.slane %v656_v62, 2 }
 0x429   :  { %v658_v19 = vadd.f32 %v657_v63, %v656_v62 }
 0x42b   :  { %v659_v55 = vrot.slane %v658_v19, 1 }
 0x42d   :  { %v660_v57 = vadd.f32 %v659_v55, %v658_v19 }
 0x42f   :  { %v661_v17 = vmul.f32 0.125, %v660_v57 }
 0x431   :  { %663 = vst.msk [vmem:[#allocation6] sm:$0x1] %vm662_vm6, %v661_v17 }
 0x432   :  { %756 = dma.done.wait [#allocation4 + $0x1], 128 }
 0x433   :  { %757 = vsyncadd [#allocation4 + $0x1], 4294967168  ;;  %s680_s29 = sshll.u32 %s1537_s14, 4  ;;  %s760_s30 = smov [#allocation6]   ;;  %s681_s29 = int_to_ptr.hbm [resolvable:$true] %s680_s29 }
 0x434   :  { %s678_s15 = sshll.u32 %s760_s30, 4  ;;  %s679_s15 = int_to_ptr.vmem [resolvable:$true] %s678_s15 }
 0x435   :  { %683 = dma.vmem_to_hbm [thread:$0]  %s679_s15, 16, %s681_s29, [#allocation7]  }
 0x436   :  { %758 = dma.done.wait [#allocation7], 16  }
 0x437   :  { %759 = vsyncadd [#allocation7], 4294967280 }
 0x438   :  { %694 = vsyncpa [#allocation7], 1 }
 0x439   :  { %695 = vsyncmov [#allocation4] }
 0x43c   :  { %s696_s4 = vpop.sfrf %695 }
 0x43d   :  { %p717_p0 = scmp.ne.s32.totalorder %s696_s4, 0 }
 0x43f   :  { %700 = shalt.err (%p717_p0)  }
 0x440   :  { %702 = vsyncmov [#allocation4 + $0x1] }
 0x443   :  { %s703_s16 = vpop.sfrf %702 }
 0x444   :  { %p718_p1 = scmp.ne.s32.totalorder %s703_s16, 0 }
 0x446   :  { %707 = shalt.err (%p718_p1)  }

</bundles_post_ra>
